<compile_context>
chip_gen: v6e
topology: v6e:2x2x1
jax: 0.10.0
libtpu: 0.0.40
codegen_flags: <defaults>
</compile_context>

<pallas_src>
import functools

import jax
import jax.numpy as jnp
from jax.experimental import pallas as pl
from jax.experimental.pallas import tpu as pltpu


def _round_up(x: int, m: int) -> int:
    return ((x + m - 1) // m) * m


def qhead_kernel(x_ref, w1_ref, b1_ref, w2_ref, b2_ref, out_ref):
    # x is read from HBM in its native dtype; cast to the matmul (weight)
    # dtype in-kernel (no extra HBM pass).  MXU accumulates in f32; bias,
    # ReLU and the store stay in f32 on the VPU.
    x = x_ref[...].astype(w1_ref.dtype)
    h = jnp.dot(x, w1_ref[...], preferred_element_type=jnp.float32) + b1_ref[...]
    h = jnp.maximum(h, 0.0)
    q = (
        jnp.dot(h.astype(w2_ref.dtype), w2_ref[...], preferred_element_type=jnp.float32)
        + b2_ref[...]
    )
    out_ref[...] = q.astype(out_ref.dtype)


@functools.partial(jax.jit, static_argnames=("tile_b", "compute_dtype"))
def qhead_forward(x, w1, b1, w2, b2, *, tile_b=2048, compute_dtype=jnp.float32):
    """x: (B, H).  w1: (H, 64), b1: (64,)|(1,64), w2: (64, A), b2: (A,)|(1,A)."""
    B, H = x.shape
    hidden = w1.shape[1]
    A = w2.shape[1]

    b1 = b1.reshape(1, hidden).astype(jnp.float32)
    b2 = b2.reshape(1, A).astype(jnp.float32)

    # Weights are tiny and VMEM-resident across grid steps -> wrapper cast is
    # fine (x itself is never cast in the wrapper; see kernel body).
    w1c = w1.astype(compute_dtype)
    w2c = w2.astype(compute_dtype)

    # ---- batch tiling ----
    # Sublane granularity for the f32 x / out tiles is 8 rows.  Cap the tile
    # at ~B/2 so the "parallel" batch axis always has >= 2 steps (v7x has two
    # TensorCores); large batches still get big tiles for pipelining.
    row_gran = 8
    half = _round_up(max((B + 1) // 2, 1), row_gran)
    eff_tile = max(row_gran, min(tile_b, half))
    eff_tile = min(eff_tile, _round_up(B, row_gran))
    grid = (pl.cdiv(B, eff_tile),)

    # True HBM traffic: x read once, out written once, plus tiny weights.
    bytes_accessed = (
        B * H * x.dtype.itemsize
        + B * A * 4
        + w1c.size * w1c.dtype.itemsize
        + w2c.size * w2c.dtype.itemsize
        + b1.size * 4
        + b2.size * 4
    )
    flops = 2 * B * H * hidden + 2 * B * hidden * A

    out = pl.pallas_call(
        qhead_kernel,
        out_shape=jax.ShapeDtypeStruct((B, A), jnp.float32),
        grid=grid,
        in_specs=[
            # x: tiled along batch, pipelined; ragged last block bounds-masked.
            pl.BlockSpec((eff_tile, H), lambda i: (i, 0)),
            # weights / biases: full arrays, constant index map -> VMEM resident.
            pl.BlockSpec((H, hidden), lambda i: (0, 0)),
            pl.BlockSpec((1, hidden), lambda i: (0, 0)),
            pl.BlockSpec((hidden, A), lambda i: (0, 0)),
            pl.BlockSpec((1, A), lambda i: (0, 0)),
        ],
        # Tight A-wide output block (A == full last dim); OOB rows masked.
        out_specs=pl.BlockSpec((eff_tile, A), lambda i: (i, 0)),
        compiler_params=pltpu.CompilerParams(
            dimension_semantics=("parallel",),
        ),
        cost_estimate=pl.CostEstimate(
            flops=flops, transcendentals=0, bytes_accessed=bytes_accessed
        ),
    )(x, w1c, b1, w2c, b2)

    return out


def _reference(x, w1, b1, w2, b2):
    return jnp.maximum(x @ w1 + b1.reshape(1, -1), 0.0) @ w2 + b2.reshape(1, -1)


if __name__ == "__main__":
    # args: rnn_hidden_dim=32, n_actions=6, batch=8
    rnn_hidden_dim = 32
    n_actions = 6
    batch = 8

    key = jax.random.PRNGKey(0)
    k_x, k_w1, k_b1, k_w2, k_b2, k_x2 = jax.random.split(key, 6)

    # Deterministic parameter init (uniform, roughly PyTorch Linear scale).
    bound1 = 1.0 / jnp.sqrt(rnn_hidden_dim)
    bound2 = 1.0 / jnp.sqrt(64.0)
    w1 = jax.random.uniform(k_w1, (rnn_hidden_dim, 64), jnp.float32, -bound1, bound1)
    b1 = jax.random.uniform(k_b1, (1, 64), jnp.float32, -bound1, bound1)
    w2 = jax.random.uniform(k_w2, (64, n_actions), jnp.float32, -bound2, bound2)
    b2 = jax.random.uniform(k_b2, (1, n_actions), jnp.float32, -bound2, bound2)

    # --- small batch (matches the module's typical per-agent use) ---
    x = jax.random.normal(k_x, (batch, rnn_hidden_dim), jnp.float32)
    qvals = qhead_forward(x, w1, b1, w2, b2)
    jax.block_until_ready(qvals)
    ref = _reference(x, w1, b1, w2, b2)
    assert qvals.shape == (batch, n_actions)
    assert jnp.allclose(qvals, ref, atol=1e-5, rtol=1e-5), "small-batch mismatch"

    # --- larger, non-multiple batch: exercises the ragged grid (no padding) ---
    big_batch = 1030
    xb = jax.random.normal(k_x2, (big_batch, rnn_hidden_dim), jnp.float32)
    qb = qhead_forward(xb, w1, b1, w2, b2)
    jax.block_until_ready(qb)
    refb = _reference(xb, w1, b1, w2, b2)
    assert qb.shape == (big_batch, n_actions)
    assert jnp.allclose(qb, refb, atol=1e-5, rtol=1e-5), "big-batch mismatch"

    # --- bf16-matmul path (in-kernel cast; v5e MXU-native), looser tolerance ---
    qb16 = qhead_forward(xb, w1, b1, w2, b2, compute_dtype=jnp.bfloat16)
    jax.block_until_ready(qb16)
    assert jnp.allclose(qb16, refb, atol=5e-2, rtol=5e-2), "bf16 path mismatch"

    print("KERNEL_OK")
</pallas_src>

<mosaic_0001>
module attributes {stable_mosaic.version = 11 : i64} {
  func.func @qhead_kernel(%arg0: i32, %arg1: memref<8x32xf32, #tpu.memory_space<vmem>>, %arg2: memref<32x64xf32, #tpu.memory_space<vmem>>, %arg3: memref<1x64xf32, #tpu.memory_space<vmem>>, %arg4: memref<64x6xf32, #tpu.memory_space<vmem>>, %arg5: memref<1x6xf32, #tpu.memory_space<vmem>>, %arg6: memref<8x6xf32, #tpu.memory_space<vmem>>) attributes {dimension_semantics = [#tpu.dimension_semantics<parallel>], iteration_bounds = array<i64: 1>, scalar_prefetch = 0 : i64, scratch_operands = 0 : i64, tpu.core_type = #tpu.core_type<tc>, window_params = [{transform_indices = @transform_0, window_bounds = array<i64: 8, 32>}, {pipeline_mode = #tpu.pipeline_mode<synchronous>, transform_indices = @transform_1, window_bounds = array<i64: 32, 64>}, {pipeline_mode = #tpu.pipeline_mode<synchronous>, transform_indices = @transform_2, window_bounds = array<i64: 1, 64>}, {pipeline_mode = #tpu.pipeline_mode<synchronous>, transform_indices = @transform_3, window_bounds = array<i64: 64, 6>}, {pipeline_mode = #tpu.pipeline_mode<synchronous>, transform_indices = @transform_4, window_bounds = array<i64: 1, 6>}, {transform_indices = @transform_5, window_bounds = array<i64: 8, 6>}]} {
    %c0 = arith.constant 0 : index
    %c0_0 = arith.constant 0 : index
    %0 = vector.load %arg1[%c0, %c0_0] : memref<8x32xf32, #tpu.memory_space<vmem>>, vector<8x32xf32>
    %c0_1 = arith.constant 0 : index
    %c0_2 = arith.constant 0 : index
    %1 = vector.load %arg2[%c0_1, %c0_2] : memref<32x64xf32, #tpu.memory_space<vmem>>, vector<32x64xf32>
    %cst = arith.constant dense<0.000000e+00> : vector<8x64xf32>
    %2 = tpu.matmul %0, %1, %cst {dimension_numbers = #tpu.dot_dimension_numbers<[1], [0], [0], [1], [0, 0, 1, 1], [], []>} : vector<8x32xf32>, vector<32x64xf32>, vector<8x64xf32> -> vector<8x64xf32>
    %c0_3 = arith.constant 0 : index
    %c0_4 = arith.constant 0 : index
    %3 = vector.load %arg3[%c0_3, %c0_4] : memref<1x64xf32, #tpu.memory_space<vmem>>, vector<1x64xf32>
    %4 = vector.broadcast %3 : vector<1x64xf32> to vector<8x64xf32>
    %5 = arith.addf %2, %4 : vector<8x64xf32>
    %cst_5 = arith.constant 0.000000e+00 : f32
    %6 = vector.broadcast %cst_5 : f32 to vector<8x64xf32>
    %7 = arith.maximumf %5, %6 : vector<8x64xf32>
    %c0_6 = arith.constant 0 : index
    %c0_7 = arith.constant 0 : index
    %8 = vector.load %arg4[%c0_6, %c0_7] : memref<64x6xf32, #tpu.memory_space<vmem>>, vector<64x6xf32>
    %cst_8 = arith.constant dense<0.000000e+00> : vector<8x6xf32>
    %9 = tpu.matmul %7, %8, %cst_8 {dimension_numbers = #tpu.dot_dimension_numbers<[1], [0], [0], [1], [0, 0, 1, 1], [], []>} : vector<8x64xf32>, vector<64x6xf32>, vector<8x6xf32> -> vector<8x6xf32>
    %c0_9 = arith.constant 0 : index
    %c0_10 = arith.constant 0 : index
    %10 = vector.load %arg5[%c0_9, %c0_10] : memref<1x6xf32, #tpu.memory_space<vmem>>, vector<1x6xf32>
    %11 = vector.broadcast %10 : vector<1x6xf32> to vector<8x6xf32>
    %12 = arith.addf %9, %11 : vector<8x6xf32>
    %c0_11 = arith.constant 0 : index
    %c0_12 = arith.constant 0 : index
    %13 = vector.load %arg6[%c0_11, %c0_12] : memref<8x6xf32, #tpu.memory_space<vmem>>, vector<8x6xf32>
    tpu.vector_store %arg6[%c0_11, %c0_12], %12 {strides = array<i32>} : memref<8x6xf32, #tpu.memory_space<vmem>>, vector<8x6xf32>,
    return
  }
  func.func @transform_0(%arg0: i32) -> (i32, i32) {
    %c0_i32 = arith.constant 0 : i32
    %c0_i32_0 = arith.constant 0 : i32
    return %arg0, %c0_i32 : i32, i32
  }
  func.func @transform_1(%arg0: i32) -> (i32, i32) {
    %c0_i32 = arith.constant 0 : i32
    %c0_i32_0 = arith.constant 0 : i32
    %c0_i32_1 = arith.constant 0 : i32
    return %c0_i32, %c0_i32_0 : i32, i32
  }
  func.func @transform_2(%arg0: i32) -> (i32, i32) {
    %c0_i32 = arith.constant 0 : i32
    %c0_i32_0 = arith.constant 0 : i32
    %c0_i32_1 = arith.constant 0 : i32
    return %c0_i32, %c0_i32_0 : i32, i32
  }
  func.func @transform_3(%arg0: i32) -> (i32, i32) {
    %c0_i32 = arith.constant 0 : i32
    %c0_i32_0 = arith.constant 0 : i32
    %c0_i32_1 = arith.constant 0 : i32
    return %c0_i32, %c0_i32_0 : i32, i32
  }
  func.func @transform_4(%arg0: i32) -> (i32, i32) {
    %c0_i32 = arith.constant 0 : i32
    %c0_i32_0 = arith.constant 0 : i32
    %c0_i32_1 = arith.constant 0 : i32
    return %c0_i32, %c0_i32_0 : i32, i32
  }
  func.func @transform_5(%arg0: i32) -> (i32, i32) {
    %c0_i32 = arith.constant 0 : i32
    %c0_i32_0 = arith.constant 0 : i32
    return %arg0, %c0_i32 : i32, i32
  }
}

</mosaic_0001>

<bundles_post_ra>
// kernel: qhead_forward.1
= control target key start
LH: loop header
LB: loop body
LE: loop exit
PB: predicated region body
PF: predicated region fallthrough
CT: control target
= control target key end

     0   :  { %v286_v1 = vmov 0.0   ;;  %vm287_vm0 = vmmov 0   ;;  %s369_s0 = inlined_call_operand.vmem [shape: f32[8,32], index: 0, kind: input, shape index: {}]   ;;  %s370_s1 = inlined_call_operand.vmem [shape: f32[32,64], index: 1, kind: input, shape index: {}]   ;;  %s371_s2 = inlined_call_operand.vmem [shape: f32[1,64], index: 2, kind: input, shape index: {}]   ;;  %s372_s3 = inlined_call_operand.vmem [shape: f32[64,6], index: 3, kind: input, shape index: {}]   ;;  %s373_s4 = inlined_call_operand.vmem [shape: f32[1,6], index: 4, kind: input, shape index: {}]   ;;  %s374_s5 = inlined_call_operand.hbm [shape: f32[8,6], index: 5, kind: output, shape index: {}]  }
   0x1   :  { %v25_v0 = vld [vmem:[%s370_s1 + $0x18] sm:$0xff]  ;;  %231 = vmatprep.subr.mxu0 %v286_v1  ;;  %v24_v2 = vld [vmem:[%s370_s1 + $0x10] sm:$0xff]  ;;  %239 = vmatprep.mubr.msk.f32.mxu0 %vm287_vm0, %v286_v1  ;;  %v23_v5 = vld [vmem:[%s370_s1 + $0x8] sm:$0xff] }
   0x2   :  { %v115_v3 = vld [vmem:[%s372_s3 + $0x38] sm:$0xff]  ;;  %232 = vmatpush3.msra.mxu0 %v25_v0  ;;  %242 = vmatprep.subr.mxu1 %v286_v1  ;;  %v114_v4 = vld [vmem:[%s372_s3 + $0x30] sm:$0xff] }
   0x3   :  { %233 = vmatprep.subr.mxu0 %v286_v1  ;;  %243 = vmatpush3.msra.mxu1 %v115_v3 }
   0x4   :  { %10 = vsyncpa [#allocation3], 0  ;;  %234 = vmatpush3.msra.mxu0 %v24_v2  ;;  %244 = vmatprep.subr.mxu1 %v286_v1  ;;  %v113_v6 = vld [vmem:[%s372_s3 + $0x28] sm:$0xff]  ;;  %v22_v7 = vld [vmem:[%s370_s1] sm:$0xff]  ;;  %vm33_vm1 = vcmask 261120   ;;  %vm123_vm2 = vcmask 523264  }
   0x5   :  { %235 = vmatprep.subr.mxu0 %v286_v1  ;;  %245 = vmatpush3.msra.mxu1 %v114_v4  ;;  %v21_v8 = vld [vmem:[%s369_s0] sm:$0xff]  ;;  %v111_v10 = vld [vmem:[%s372_s3 + $0x18] sm:$0xff]  ;;  %v110_v11 = vld [vmem:[%s372_s3 + $0x10] sm:$0xff]  ;;  %s288_s21 = smov [#allocation2]   ;;  %vm197_vm3 = vcmask 48128  }
   0x6   :  { %236 = vmatpush3.msra.mxu0 %v23_v5  ;;  %246 = vmatprep.subr.mxu1 %v286_v1  ;;  %v112_v9 = vld [vmem:[%s372_s3 + $0x20] sm:$0xff]  ;;  %v109_v12 = vld [vmem:[%s372_s3 + $0x8] sm:$0xff]  ;;  %s205_s22 = sshll.u32 %s288_s21, 4  ;;  %s206_s22 = int_to_ptr.vmem [resolvable:$true] %s205_s22 }
   0x7   :  { %237 = vmatprep.subr.mxu0 %v286_v1  ;;  %247 = vmatpush3.msra.mxu1 %v113_v6  ;;  %v108_v13 = vld [vmem:[%s372_s3] sm:$0xff]  ;;  %s264_s3 = scalar_lea.vmem %s206_s22, 128  ;;  %p269_p1 = scmp.lt.s32.totalorder %s206_s22, %s206_s22 }
   0x8   :  { %238 = vmatpush3.msra.mxu0 %v22_v7  ;;  %248 = vmatprep.subr.mxu1 %v286_v1  ;;  %v213_v14 = vld [vmem:[%s371_s2] ss:$0 sm:$0xff]  ;;  %p265_p0 = scmp.ne.s32.totalorder %s206_s22, %s264_s3  ;;  %p270_p2 = scmp.lt.s32.totalorder %s264_s3, %s264_s3 }
   0x9   :  { %240 = vmatmul.mubr.msk.f32.vlgmr.msra.gmra.mxu0 %vm33_vm1, %v21_v8  ;;  %249 = vmatpush3.msra.mxu1 %v112_v9  ;;  %v215_v19 = vld [vmem:[%s373_s4] ss:$0 sm:$0xff] }
   0xa   :  { %250 = vmatprep.subr.mxu1 %v286_v1  ;;  %258 = vmatprep.mubr.msk.f32.mxu1 %vm287_vm0, %v286_v1  ;;  %p271_p3 = por %p270_p2, %p269_p1 }
   0xb   :  { %251 = vmatpush3.msra.mxu1 %v111_v10 }
   0xc   :  { %252 = vmatprep.subr.mxu1 %v286_v1  ;;  %p272_p4 = pnand %p271_p3, %p265_p0 }
   0xd   :  { %253 = vmatpush3.msra.mxu1 %v110_v11 }
   0xe   :  { %254 = vmatprep.subr.mxu1 %v286_v1 }
   0xf   :  { %255 = vmatpush3.msra.mxu1 %v109_v12 }
  0x10   :  { %256 = vmatprep.subr.mxu1 %v286_v1 }
  0x11   :  { %257 = vmatpush3.msra.mxu1 %v108_v13 }
  0xc9   :  { %v103_v15 = vpop.f32.mrf.mxu0 }
  0xca   :  { %v104_v16 = vadd.f32 %v213_v14, %v103_v15 }
  0xcb   :  { %v241_v17 = vpop.f32.mrf.mxu0 }
  0xcc   :  { %v107_v18 = vmax.f32 %v104_v16, 0.0 }
  0xce   :  { %259 = vmatmul.mubr.msk.f32.vlgmr.msra.gmra.mxu1 %vm123_vm2, %v107_v18 }
 0x18e   :  { %v193_v20 = vpop.f32.mrf.mxu1 }
 0x18f   :  { %v194_v21 = vadd.f32 %v215_v19, %v193_v20 }
 0x190   :  { %v260_v22 = vpop.f32.mrf.mxu1 }
 0x191   :  { %198 = vst.msk [vmem:[#allocation2] sm:$0xff] %vm197_vm3, %v194_v21 }
 0x192   :  { %275 = shalt.err (!%p272_p4)
}
 0x193   :  { %208 = dma.vmem_to_hbm [thread:$0]  %s206_s22, 128, %s374_s5, [#allocation3]  }
 0x194   :  { %284 = dma.done.wait [#allocation3], 128  }
 0x195   :  { %285 = vsyncadd [#allocation3], 4294967168 }
 0x196   :  { %212 = vsyncpa [#allocation3], 1 }

</bundles_post_ra>
